<compile_context>
chip_gen: v6e
topology: v6e:2x2x1
jax: 0.10.0
libtpu: 0.0.40
codegen_flags: <defaults>
</compile_context>

<pallas_src>
import functools

import jax
import jax.numpy as jnp
from jax import lax
from jax.experimental import pallas as pl
from jax.experimental.pallas import tpu as pltpu


_VMEM_BUDGET = 24 << 20   # per-step buffer budget (2x in + 2x out + weights)
_VMEM_LIMIT = 32 << 20    # raise v5e's 16 MiB scoped default; == v6e/v7x default


def _hsigmoid(y):
    return jnp.clip(y + 3.0, 0.0, 6.0) * (1.0 / 6.0)


def _fc_hsigmoid(mean, w, b):
    """hsigmoid(mean @ w.T + b) in f32.  mean: (bn, C); w: (C, C); b: (1, C)."""
    c = w.shape[0]
    if c >= 128:
        # MXU path: lane-aligned for real eSE channel counts (128..1024).
        y = lax.dot_general(mean, w, (((1,), (1,)), ((), ())),
                            preferred_element_type=jnp.float32)
    else:
        # Toy channel counts: tiny broadcast-multiply-reduce on the VPU keeps
        # us off any sub-tile MXU path; intermediate is only bn*C*C f32.
        y = jnp.sum(mean[:, None, :] * w[None, :, :], axis=-1)
    return _hsigmoid(y + b)


# ----------------------------- fused single pass -----------------------------
def _fused_ese_kernel(x_ref, w_ref, b_ref, o_ref, *, hw):
    # x_ref/o_ref: (bn, C, HW); w_ref: (C, C) f32; b_ref: (1, C) f32.
    sums = jnp.sum(x_ref[...], axis=-1, dtype=jnp.float32)          # (bn, C)
    scale = _fc_hsigmoid(sums * (1.0 / hw), w_ref[...], b_ref[...])  # (bn, C)
    # Multiply by the f32 scale, cast the product (matches PyTorch ordering).
    o_ref[...] = (x_ref[...] * scale[:, :, None]).astype(o_ref.dtype)


# --------------------------- two-pass fallback path ---------------------------
def _partial_sum_kernel(x_ref, psum_ref, *, hw, tile, n_inner, n_tiles):
    # x_ref: (1, C, tile); psum_ref: (1, 1, C, 1) f32, resident across axis 2.
    o = pl.program_id(1)
    i = pl.program_id(2)
    t = o * n_inner + i                 # global spatial-tile index (may overshoot)

    @pl.when(i == 0)
    def _():
        psum_ref[...] = jnp.zeros_like(psum_ref)

    if hw % tile == 0:
        @pl.when(t < n_tiles)           # guard over-covered tiles from the o-split
        def _():
            psum_ref[...] += jnp.sum(x_ref[...], axis=-1, keepdims=True,
                                     dtype=jnp.float32)[None]
    else:
        @pl.when(t < n_tiles - 1)
        def _():                        # interior tiles: no mask cost
            psum_ref[...] += jnp.sum(x_ref[...], axis=-1, keepdims=True,
                                     dtype=jnp.float32)[None]

        @pl.when(t == n_tiles - 1)
        def _():                        # only the ragged edge tile pays the iota
            x = x_ref[...]
            lane = lax.broadcasted_iota(jnp.int32, x.shape, 2)
            x = jnp.where(lane + t * tile < hw, x, jnp.zeros_like(x))
            psum_ref[...] += jnp.sum(x, axis=-1, keepdims=True,
                                     dtype=jnp.float32)[None]


def _scale_kernel(x_ref, s_ref, o_ref):
    # x_ref: (1, C, tile); s_ref: (1, C, 1) f32 (C on sublanes => the lane
    # broadcast is free on the VPU); o_ref: (1, C, tile) in the input dtype.
    o_ref[...] = (x_ref[...] * s_ref[...]).astype(o_ref.dtype)


# ------------------------------- tile selection -------------------------------
def _choose_batch_tile(n, c, hw, itemsize):
    """Images per fused block; 0 => per-image slab too big, use two-pass path."""
    slab = c * hw * itemsize                         # one image, one buffer
    wbytes = 2 * c * c * 4 + 2 * max(c, 128) * 4     # resident weight + bias
    avail = _VMEM_BUDGET - wbytes
    if avail < 4 * slab:                             # in + out, double-buffered
        return 0
    bn = min(avail // (4 * slab),                    # VMEM budget
             max(1, -(-(1 << 20) // slab)),          # aim for >= ~1 MiB x-blocks
             n)
    if n >= 2:                                       # keep >= 2 grid steps so the
        bn = min(bn, -(-n // 2))                     # pipeline / both v7x TCs work
    return max(int(bn), 1)


def _choose_spatial_tile(hw, c, itemsize):
    """Lane-dense spatial tile for the two-pass path (multiple of 128)."""
    if hw < 128:
        return hw                                    # only legal lane block
    per_lane = c * itemsize
    target = (2 << 20) // per_lane                   # ~2 MiB blocks
    cap = (_VMEM_BUDGET // 4) // per_lane            # 4 buffers live in pass 2
    t = max(128, min(target, cap))
    t = (t // 128) * 128
    return max(128, min(t, (hw // 128) * 128))


# ----------------------------------- wrapper -----------------------------------
def ese_module(x_nchw, weight, bias, *, force_two_pass=False):
    """eSE forward: out = x * hsigmoid(Conv1x1(GlobalAvgPool(x))).

    x_nchw: (N, C, H, W); weight: (C, C) or (C, C, 1, 1); bias: (C,).
    """
    N, C, H, W = x_nchw.shape
    HW = H * W
    dt = x_nchw.dtype
    x3 = x_nchw.reshape(N, C, HW)                    # metadata-only reshape
    w = weight.reshape(C, C).astype(jnp.float32)
    b = bias.reshape(1, C).astype(jnp.float32)

    bn = 0 if force_two_pass else _choose_batch_tile(N, C, HW, x3.dtype.itemsize)

    if bn > 0:
        # ----------------- fused single-pass kernel (2x HBM traffic) -----------------
        out = pl.pallas_call(
            functools.partial(_fused_ese_kernel, hw=HW),
            out_shape=jax.ShapeDtypeStruct((N, C, HW), dt),
            grid_spec=pltpu.PrefetchScalarGridSpec(
                num_scalar_prefetch=0,
                grid=(pl.cdiv(N, bn),),
                in_specs=[
                    pl.BlockSpec((bn, C, HW), lambda nb: (nb, 0, 0)),
                    pl.BlockSpec((C, C), lambda nb: (0, 0)),    # resident weight
                    pl.BlockSpec((1, C), lambda nb: (0, 0)),    # resident bias
                ],
                out_specs=pl.BlockSpec((bn, C, HW), lambda nb: (nb, 0, 0)),
            ),
            compiler_params=pltpu.CompilerParams(
                dimension_semantics=("parallel",),
                vmem_limit_bytes=_VMEM_LIMIT),
        )(x3, w, b)
        return out.reshape(N, C, H, W)

    # -------------- two-pass fallback (per-image slab exceeds VMEM budget) --------------
    thw = _choose_spatial_tile(HW, C, x3.dtype.itemsize)
    n_tiles = pl.cdiv(HW, thw)
    n_out = 2 if n_tiles >= 2 else 1                 # feed both v7x TCs even at N==1
    n_in = pl.cdiv(n_tiles, n_out)

    psums = pl.pallas_call(
        functools.partial(_partial_sum_kernel, hw=HW, tile=thw,
                          n_inner=n_in, n_tiles=n_tiles),
        out_shape=jax.ShapeDtypeStruct((N, n_out, C, 1), jnp.float32),
        grid_spec=pltpu.PrefetchScalarGridSpec(
            num_scalar_prefetch=0,
            grid=(N, n_out, n_in),
            in_specs=[pl.BlockSpec((1, C, thw),
                                   lambda n, o, i: (n, 0, o * n_in + i))],
            out_specs=pl.BlockSpec((1, 1, C, 1), lambda n, o, i: (n, o, 0, 0)),
        ),
        compiler_params=pltpu.CompilerParams(
            dimension_semantics=("parallel", "parallel", "arbitrary"),
            vmem_limit_bytes=_VMEM_LIMIT),
    )(x3)

    # Tiny FC + hsigmoid once for all N, off the pipelined hot path.
    sums = jnp.sum(psums[:, :, :, 0], axis=1)        # (N, C)
    scale = _fc_hsigmoid(sums * (1.0 / HW), w, b)    # (N, C) f32
    scale = scale.reshape(N, C, 1)                   # channels -> sublanes

    out = pl.pallas_call(
        _scale_kernel,
        out_shape=jax.ShapeDtypeStruct((N, C, HW), dt),
        grid_spec=pltpu.PrefetchScalarGridSpec(
            num_scalar_prefetch=0,
            grid=(N, n_tiles),
            in_specs=[
                pl.BlockSpec((1, C, thw), lambda n, j: (n, 0, j)),
                pl.BlockSpec((1, C, 1), lambda n, j: (n, 0, 0)),
            ],
            out_specs=pl.BlockSpec((1, C, thw), lambda n, j: (n, 0, j)),
        ),
        compiler_params=pltpu.CompilerParams(
            dimension_semantics=("parallel", "parallel"),
            vmem_limit_bytes=_VMEM_LIMIT),
    )(x3, scale)
    return out.reshape(N, C, H, W)


def _reference(x, weight, bias):
    # Pure-JAX reference (f32) for sanity checking.
    C = x.shape[1]
    w = weight.reshape(C, C).astype(jnp.float32)
    xf = x.astype(jnp.float32)
    mean = jnp.mean(xf, axis=(2, 3))                 # (N, C)
    y = mean @ w.T + bias.astype(jnp.float32)
    s = jnp.clip(y + 3.0, 0.0, 6.0) / 6.0
    return xf * s[:, :, None, None]


if __name__ == "__main__":
    key = jax.random.PRNGKey(0)
    cases = [
        ((2, 4, 16, 16), jnp.float32, False),    # fused, aligned HW, VPU FC
        ((2, 8, 14, 14), jnp.float32, False),    # fused, HW=196 (full-dim block)
        ((1, 16, 7, 7), jnp.float32, False),     # fused, HW < 128
        ((2, 8, 14, 14), jnp.bfloat16, False),   # fused, bf16 input path
        ((3, 8, 10, 10), jnp.float32, False),    # fused, partial batch block
        ((2, 128, 8, 8), jnp.float32, False),    # fused, MXU FC path (C >= 128)
        ((2, 8, 14, 14), jnp.float32, True),     # two-pass fallback, ragged edge
        ((1, 16, 7, 7), jnp.float32, True),      # two-pass fallback, HW < 128
    ]
    for shape, dtype, two_pass in cases:
        N, C, H, W = shape
        kx, kw, kb, key = jax.random.split(key, 4)
        x = jax.random.normal(kx, shape, dtype=jnp.float32).astype(dtype)
        weight = jax.random.normal(kw, (C, C), dtype=jnp.float32) * 0.1
        bias = jax.random.normal(kb, (C,), dtype=jnp.float32) * 0.1

        out = jax.block_until_ready(
            ese_module(x, weight, bias, force_two_pass=two_pass))
        ref = _reference(x, weight, bias)

        assert out.shape == shape and out.dtype == dtype, (shape, two_pass)
        tol = 3e-2 if dtype == jnp.bfloat16 else 1e-5
        assert jnp.allclose(out.astype(jnp.float32), ref, atol=tol, rtol=tol), (
            shape, two_pass)

    print("KERNEL_OK")
</pallas_src>

<mosaic_0001>
module attributes {stable_mosaic.version = 11 : i64} {
  func.func @_fused_ese_kernel(%arg0: i32, %arg1: memref<1x4x256xf32, #tpu.memory_space<vmem>>, %arg2: memref<4x4xf32, #tpu.memory_space<vmem>>, %arg3: memref<1x4xf32, #tpu.memory_space<vmem>>, %arg4: memref<1x4x256xf32, #tpu.memory_space<vmem>>) attributes {dimension_semantics = [#tpu.dimension_semantics<parallel>], iteration_bounds = array<i64: 2>, scalar_prefetch = 0 : i64, scratch_operands = 0 : i64, tpu.core_type = #tpu.core_type<tc>, window_params = [{transform_indices = @transform_0, window_bounds = array<i64: 1, 4, 256>}, {pipeline_mode = #tpu.pipeline_mode<synchronous>, transform_indices = @transform_1, window_bounds = array<i64: 4, 4>}, {pipeline_mode = #tpu.pipeline_mode<synchronous>, transform_indices = @transform_2, window_bounds = array<i64: 1, 4>}, {transform_indices = @transform_3, window_bounds = array<i64: 1, 4, 256>}]} {
    %c0 = arith.constant 0 : index
    %c0_0 = arith.constant 0 : index
    %c0_1 = arith.constant 0 : index
    %0 = vector.load %arg1[%c0, %c0_0, %c0_1] : memref<1x4x256xf32, #tpu.memory_space<vmem>>, vector<1x4x256xf32>
    %cst = arith.constant dense<0.000000e+00> : vector<1x4xf32>
    %1 = vector.multi_reduction <add>, %0, %cst [2] : vector<1x4x256xf32> to vector<1x4xf32>
    %cst_2 = arith.constant 3.906250e-03 : f32
    %2 = vector.broadcast %cst_2 : f32 to vector<1x4xf32>
    %3 = arith.mulf %1, %2 : vector<1x4xf32>
    %c0_3 = arith.constant 0 : index
    %c0_4 = arith.constant 0 : index
    %4 = vector.load %arg2[%c0_3, %c0_4] : memref<4x4xf32, #tpu.memory_space<vmem>>, vector<4x4xf32>
    %c0_5 = arith.constant 0 : index
    %c0_6 = arith.constant 0 : index
    %5 = vector.load %arg3[%c0_5, %c0_6] : memref<1x4xf32, #tpu.memory_space<vmem>>, vector<1x4xf32>
    %6 = vector.shape_cast %3 : vector<1x4xf32> to vector<1x1x4xf32>
    %7 = vector.shape_cast %4 : vector<4x4xf32> to vector<1x4x4xf32>
    %8 = vector.broadcast %6 : vector<1x1x4xf32> to vector<1x4x4xf32>
    %9 = arith.mulf %8, %7 : vector<1x4x4xf32>
    %cst_7 = arith.constant dense<0.000000e+00> : vector<1x4xf32>
    %10 = vector.multi_reduction <add>, %9, %cst_7 [2] : vector<1x4x4xf32> to vector<1x4xf32>
    %11 = arith.addf %10, %5 : vector<1x4xf32>
    %cst_8 = arith.constant 3.000000e+00 : f32
    %12 = vector.broadcast %cst_8 : f32 to vector<1x4xf32>
    %13 = arith.addf %11, %12 : vector<1x4xf32>
    %cst_9 = arith.constant 0.000000e+00 : f32
    %cst_10 = arith.constant 6.000000e+00 : f32
    %14 = vector.broadcast %cst_9 : f32 to vector<1x4xf32>
    %15 = arith.maximumf %14, %13 : vector<1x4xf32>
    %16 = vector.broadcast %cst_10 : f32 to vector<1x4xf32>
    %17 = arith.minimumf %16, %15 : vector<1x4xf32>
    %cst_11 = arith.constant 0.166666672 : f32
    %18 = vector.broadcast %cst_11 : f32 to vector<1x4xf32>
    %19 = arith.mulf %17, %18 : vector<1x4xf32>
    %c0_12 = arith.constant 0 : index
    %c0_13 = arith.constant 0 : index
    %c0_14 = arith.constant 0 : index
    %20 = vector.load %arg1[%c0_12, %c0_13, %c0_14] : memref<1x4x256xf32, #tpu.memory_space<vmem>>, vector<1x4x256xf32>
    %21 = vector.shape_cast %19 : vector<1x4xf32> to vector<1x4x1xf32>
    %22 = vector.broadcast %21 : vector<1x4x1xf32> to vector<1x4x256xf32>
    %23 = arith.mulf %20, %22 : vector<1x4x256xf32>
    %c0_15 = arith.constant 0 : index
    %c0_16 = arith.constant 0 : index
    %c0_17 = arith.constant 0 : index
    %24 = vector.load %arg4[%c0_15, %c0_16, %c0_17] : memref<1x4x256xf32, #tpu.memory_space<vmem>>, vector<1x4x256xf32>
    tpu.vector_store %arg4[%c0_15, %c0_16, %c0_17], %23 {strides = array<i32>} : memref<1x4x256xf32, #tpu.memory_space<vmem>>, vector<1x4x256xf32>,
    return
  }
  func.func @transform_0(%arg0: i32) -> (i32, i32, i32) {
    %c0_i32 = arith.constant 0 : i32
    %c0_i32_0 = arith.constant 0 : i32
    %c0_i32_1 = arith.constant 0 : i32
    return %arg0, %c0_i32, %c0_i32_0 : i32, i32, i32
  }
  func.func @transform_1(%arg0: i32) -> (i32, i32) {
    %c0_i32 = arith.constant 0 : i32
    %c0_i32_0 = arith.constant 0 : i32
    %c0_i32_1 = arith.constant 0 : i32
    return %c0_i32, %c0_i32_0 : i32, i32
  }
  func.func @transform_2(%arg0: i32) -> (i32, i32) {
    %c0_i32 = arith.constant 0 : i32
    %c0_i32_0 = arith.constant 0 : i32
    %c0_i32_1 = arith.constant 0 : i32
    return %c0_i32, %c0_i32_0 : i32, i32
  }
  func.func @transform_3(%arg0: i32) -> (i32, i32, i32) {
    %c0_i32 = arith.constant 0 : i32
    %c0_i32_0 = arith.constant 0 : i32
    %c0_i32_1 = arith.constant 0 : i32
    return %arg0, %c0_i32, %c0_i32_0 : i32, i32, i32
  }
}

</mosaic_0001>

<bundles_post_ra>
// kernel: tpu_custom_call.1
= control target key start
LH: loop header
LB: loop body
LE: loop exit
PB: predicated region body
PF: predicated region fallthrough
CT: control target
= control target key end

     0   :  { %8 = vsyncpa [#allocation3], 0  ;;  %s835_s0 = inlined_call_operand.hbm [shape: f32[2,4,256], index: 0, kind: input, shape index: {}]   ;;  %s836_s1 = inlined_call_operand.hbm [shape: f32[4,4], index: 1, kind: input, shape index: {}]   ;;  %s837_s2 = inlined_call_operand.vmem [shape: f32[1,4], index: 2, kind: input, shape index: {}]   ;;  %s838_s3 = inlined_call_operand.hbm [shape: f32[2,4,256], index: 3, kind: output, shape index: {}]  }
   0x1   :  { %10 = vsyncpa [#allocation3 + $0x1], 0 }
   0x2   :  { %11 = vsyncpa [#allocation6], 0 }
   0x3   :  { %12 = vsyncpa [#allocation4], 0 }
   0x4   :  { %14 = vsyncpa [#allocation4 + $0x1], 0  ;;  %s648_s12 = smov 0   ;;  %s650_s13 = smov 0  }
   0x5   :  { %s652_s14 = smov 0   ;;  %s654_s15 = smov 0  }
   0x6 LB: > { %s669_s16 = sadd.s32 4294967295, %s621_s15   ;;  %s418_s17 = sadd.s32 4294967294, %s621_s15   ;;  %s621_s15 = sphi %s654_s15, %s861_s15   ;;  %s617_s14 = sphi %s652_s14, %s860_s14   ;;  %s613_s13 = sphi %s650_s13, %s859_s13   ;;  %s609_s12 = sphi %s648_s12, %s858_s12  }
   0x7   : > { %p40_p0 = scmp.ne.s32.totalorder %s613_s13, %s609_s12  ;;  %p839_p1 = scmp.eq.s32.totalorder %s669_s16, 0 }
   0x8   : > { %p112_p3 = scmp.eq.s32.totalorder %s418_s17, 1  ;;  %p419_p5 = scmp.ge.s32.totalorder %s621_s15, 1 }
   0x9   : > { %p678_p4 = por %p839_p1, %p40_p0  ;;  %p119_p7 = scmp.lt.s32.totalorder %s621_s15, 3 }
   0xa   : > { %p683_p6 = por %p112_p3, %p40_p0  ;;  %s623_s21 = smov [#allocation5]  }
   0xb   : > { %s843_s18 = scalar_select %p678_p4, 1, 0 }
   0xc   : > { %s844_s19 = scalar_select %p683_p6, 1, 0 }
   0xd   : > { %p688_p8 = pnand %p419_p5, %p119_p7  ;;  %s132_s22 = sshll.u32 %s623_s21, 4  ;;  %s133_s22 = int_to_ptr.vmem [resolvable:$true] %s132_s22 }
   0xe   : > { %s696_s23 = sadd.s32 1, %s621_s15   ;;  %s27_s27 = sadd.s32 1, %s617_s14 }
   0xf   : > { %s845_s20 = scalar_select %p688_p8, 1, 0 }
  0x10   : > { %p445_p10 = pneg %p688_p8  ;;  %s24_s25 = ssub.s32 %s621_s15, %s696_s23 }
  0x11   : > { %p706_p12 = scmp.eq.s32.totalorder %s24_s25, 0  ;;  %p34_p13 = scmp.ne.s32.totalorder %s617_s14, %s613_s13 }
  0x12   : > { %p700_p11 = pnand %p445_p10, %p839_p1  ;;  %s510_s28 = scalar_lea.vmem %s133_s22, 64 }
  0x13   : > { %p511_p3 = scmp.ne.s32.totalorder %s133_s22, %s510_s28  ;;  %p518_p9 = scmp.lt.s32.totalorder %s133_s22, %s133_s22 }
  0x14   : > { %p501_p0 = pneg %p700_p11  ;;  %p519_p2 = scmp.lt.s32.totalorder %s510_s28, %s510_s28 }
  0x16   : > { %p513_p5 = pnand %p511_p3, %p501_p0  ;;  %p520_p10 = por %p519_p2, %p518_p9 }
  0x18   : > { %p514_p7 = pneg %p513_p5 }
  0x1a   : > { %p521_p1 = pnand %p520_p10, %p514_p7 }
  0x1c   : > { %524 = shalt.err (!%p521_p1)
}
  0x1d   : > { %448 = dma.hbm_to_vmem [thread:$0]  (!%p700_p11), %s836_s1, 64, %s133_s22, [#allocation6]  }
  0x1e   : > { %s723_s4 = scalar_select %p706_p12, %s617_s14, %s27_s27  }
  0x1f   : > { %p35_p1 = scmp.eq.s32.totalorder %s621_s15, 0  ;;  %p848_p2 = scmp.eq.s32.totalorder %s669_s16, 1 }
  0x20   : > { %p458_p0 = scmp.lt.s32.totalorder %s621_s15, 2  ;;  %s146_s6 = sand.u32 1, %s617_s14  }
  0x21   : > { %p731_p9 = por %p848_p2, %p34_p13  ;;  %p36_p3 = por %p35_p1, %p34_p13 }
  0x22   : > { %s422_s7 = sshll.u32 %s146_s6, 3  ;;  %s435_s8 = sshll.u32 %s621_s15, 7 }
  0x23   : > { %s849_s5 = scalar_select %p731_p9, 1, 0 }
  0x24   : > { %s744_s11 = scalar_lea.hbm %s835_s0, %s435_s8  ;;  %s150_s17 = scalar_lea.vmem [#allocation2], %s422_s7 }
  0x25   : > { %s158_s21 = sshll.u32 %s150_s17, 4  ;;  %p746_p11 = pnand %p458_p0, %p36_p3  ;;  %s159_s21 = int_to_ptr.vmem [resolvable:$true] %s158_s21 }
  0x26   : > { %s147_s24 = scalar_lea.sflag [#allocation3], %s146_s6  ;;  %s525_s25 = scalar_lea.hbm %s744_s11, 128 }
  0x27   : > { %p526_p12 = scmp.ne.s32.totalorder %s744_s11, %s525_s25  ;;  %p527_p13 = pneg %p746_p11 }
  0x28   : > { %s530_s28 = scalar_lea.hbm %s835_s0, 256  ;;  %p531_p10 = scmp.lt.s32.totalorder %s744_s11, %s835_s0 }
  0x29   : > { %p528_p5 = pnand %p527_p13, %p526_p12  ;;  %p532_p1 = scmp.lt.s32.totalorder %s530_s28, %s525_s25 }
  0x2b   : > { %p529_p7 = pneg %p528_p5  ;;  %p533_p2 = por %p532_p1, %p531_p10 }
  0x2d   : > { %p534_p0 = pnand %p533_p2, %p529_p7 }
  0x2f   : > { %537 = shalt.err (!%p534_p0)
}
  0x30   : > { %s538_s7 = scalar_lea.vmem %s159_s21, 128  ;;  %s624_s6 = smov [#allocation2]  }
  0x31   : > { %p539_p3 = scmp.ne.s32.totalorder %s159_s21, %s538_s7  ;;  %s543_s8 = sshll.u32 %s624_s6, 4  ;;  %s544_s8 = int_to_ptr.vmem [resolvable:$false] %s543_s8 }
  0x32   : > { %s545_s9 = scalar_lea.vmem %s544_s8, 256  ;;  %p546_p12 = scmp.lt.s32.totalorder %s159_s21, %s544_s8 }
  0x33   : > { %p541_p6 = pnand %p539_p3, %p527_p13  ;;  %p547_p5 = scmp.lt.s32.totalorder %s545_s9, %s538_s7 }
  0x35   : > { %p542_p9 = pneg %p541_p6  ;;  %p548_p4 = por %p547_p5, %p546_p12 }
  0x37   : > { %p549_p8 = pnand %p548_p4, %p542_p9 }
  0x39   : > { %552 = shalt.err (!%p549_p8)
}
  0x3a   : > { %452 = dma.hbm_to_vmem [thread:$0]  (!%p746_p11), %s744_s11, 128, %s159_s21, %s147_s24  }
  0x3b   : > { %p851_p7 = scmp.ne.s32.totalorder %s845_s20, 0 }
  0x3c   : > { %s767_s10 = sand.u32 (!%p851_p7), 1, %s613_s13   ;;  %p852_p4 = scmp.ne.s32.totalorder (!%p851_p7), %s843_s18, 0 }
  0x3d   : > { %167 = sbr.rel (%p851_p7) target bundleno = 649 (0x289), region = 32  ;;  %s426_s17 = sshll.u32 (!%p851_p7), %s767_s10, 3 }
  0x3e   : > { %s170_s25 = scalar_lea.sflag (!%p851_p7), [#allocation3], %s767_s10  ;;  %s173_s26 = scalar_lea.vmem (!%p851_p7), [#allocation2], %s426_s17 }
  0x42   : > { %596 = dma.done.wait (%p852_p4), %s170_s25, 128  }
  0x43   : > { %598 = vsyncadd (%p852_p4), %s170_s25, 4294967168  ;;  %p853_p6 = scmp.eq.s32.totalorder %s669_s16, 0 }
  0x45   : > { %600 = dma.done.wait (%p853_p6), [#allocation6], 64   ;;  %p854_p8 = pmov %p853_p6 }
  0x46   : > { %v214_v0 = vlaneseq  ;;  %vm204_vm0 = vcmask 1043456   ;;  %v785_v4 = vld [vmem:[%s173_s26] sm:$0xff]  ;;  %v211_v5 = vld [vmem:[#allocation5] sm:$0xf]  ;;  %v625_v15 = vmov 0   ;;  %vm284_vm1 = vcmask 1041409  }
  0x47   : > { %602 = vsyncadd (%p854_p8), [#allocation6], 4294967232  ;;  %v202_v6 = vcombine.high %v785_v4, %v785_v4  ;;  %v205_v7 = vsel %vm204_vm0, %v785_v4, 0.0  ;;  %496 = vset.pattern.permute.xlu1 %v625_v15  ;;  %497 = vset.pattern.permute.xlu0 %v625_v15  ;;  %v429_v27 = vld [vmem:[%s837_s2] ss:$0 sm:$0xff]  ;;  %vm286_vm2 = vcmask 1042434  }
  0x48   : > { %v781_v1 = vshrl.u32 %v214_v0, 7  ;;  %v267_v29 = vand.u32 127, %v214_v0  ;;  %vm288_vm3 = vcmask 1043459   ;;  %vm291_vm4 = vcmask 27648   ;;  %s436_s11 = sshll.u32 %s669_s16, 7  ;;  %s199_s21 = scalar_lea.vmem [#allocation7], %s426_s17 }
  0x49   : > { %v206_v9 = vsel %vm204_vm0, %v202_v6, 0.0  ;;  %v626_v49 = vmov 839922192   ;;  %s338_s22 = sshll.u32 %s199_s21, 4  ;;  %s336_s28 = scalar_lea.hbm %s838_s3, %s436_s11  ;;  %s339_s22 = int_to_ptr.vmem [resolvable:$true] %s338_s22 }
  0x4a   : > { %v223_v2 = vsub.s32 1, %v781_v1  ;;  %v230_v3 = vsub.s32 2, %v781_v1  ;;  %v237_v11 = vsub.s32 3, %v781_v1  ;;  %v207_v12 = vadd.f32 %v206_v9, %v205_v7  ;;  %s324_s29 = scalar_lea.sflag [#allocation4], %s767_s10  ;;  %s553_s30 = scalar_lea.vmem %s339_s22, 128 }
  0x4b   : > { %v216_v14 = vsub.s32 0, %v781_v1  ;;  %v270_v31 = vsub.s32 %v267_v29, %v781_v1  ;;  %v314_v50 = vunpack.c.l.s4 %v626_v49  ;;  %p554_p9 = scmp.ne.s32.totalorder %s339_s22, %s553_s30  ;;  %p855_p11 = scmp.ne.s32.totalorder %s849_s5, 0 }
  0x4c   : > { %v224_v8 = vrot.slane %v211_v5, %v223_v2  ;;  %v231_v10 = vrot.slane %v211_v5, %v230_v3  ;;  %208 = vadd.xlane.f32.xlu0 %v207_v12  ;;  %v238_v13 = vrot.slane %v211_v5, %v237_v11  ;;  %s627_s7 = smov [#allocation7]  }
  0x4d   : > { %v217_v16 = vrot.slane %v211_v5, %v216_v14  ;;  %v315_v51 = vunpack.c.0.s8 %v314_v50  ;;  %p555_p13 = pnand %p554_p9, %p855_p11  ;;  %s557_s16 = sshll.u32 %s627_s7, 4  ;;  %s558_s16 = int_to_ptr.vmem [resolvable:$false] %s557_s16 }
  0x4e   : > { %226 = vbcast.lane.b32.xlu1 %v224_v8, 256  ;;  %s559_s6 = scalar_lea.vmem %s558_s16, 256  ;;  %p560_p1 = scmp.lt.s32.totalorder %s339_s22, %s558_s16 }
  0x4f   : > { %v318_v52 = vsub.s32 %v315_v51, %v781_v1  ;;  %p556_p10 = pneg %p555_p13  ;;  %p561_p2 = scmp.lt.s32.totalorder %s559_s6, %s553_s30 }
  0x51   : > { %p562_p0 = por %p561_p2, %p560_p1 }
  0x52   : > { %233 = vbcast.lane.b32.xlu1 %v231_v10, 256 }
  0x53   : > { %p563_p3 = pnand %p562_p0, %p556_p10 }
  0x56   : > { %240 = vbcast.lane.b32.xlu1 %v238_v13, 256 }
  0x62   : > { %219 = vbcast.lane.b32.xlu0 %v217_v16, 256 }
  0xc0   : > { %v227_v18 = vpop.permute.xlu1 %226 }
  0xc4   : > { %v234_v22 = vpop.permute.xlu1 %233 }
  0xc8   : > { %v241_v25 = vpop.permute.xlu1 %240 }
  0xd5   : > { %v209_v17 = vpop.xlane.xlu0 %208 }
  0xd6   : > { %v210_v19 = vmul.f32 0.00390625, %v209_v17 }
  0xd8   : > { %v247_v23 = vmul.f32 %v227_v18, %v210_v19  ;;  %v248_v24 = vmul.f32 %v234_v22, %v210_v19  ;;  %v249_v26 = vmul.f32 %v241_v25, %v210_v19 }
  0xd9   : > { %v220_v20 = vpop.permute.xlu0 %219 }
  0xda   : > { %v246_v21 = vmul.f32 %v220_v20, %v210_v19 }
  0xdc   : > { %255 = vperm.xlu1 %496, %v246_v21  }
  0xe0   : > { %258 = vperm.xlu1 %496, %v247_v23  }
  0xe4   : > { %261 = vperm.xlu1 %496, %v248_v24  }
  0xe8   : > { %264 = vperm.xlu1 %496, %v249_v26  }
  0xec   : > { %301 = vbcast.lane.b32.xlu1 %v429_v27, 256 }
 0x157   : > { %v256_v28 = vpop.permute.xlu1 %255 }
 0x158   : > { %v271_v35 = vrot.slane %v256_v28, %v270_v31 }
 0x15b   : > { %v259_v30 = vpop.permute.xlu1 %258 }
 0x15c   : > { %v275_v33 = vrot.slane %v259_v30, %v270_v31 }
 0x15e   : > { %v285_v37 = vsel %vm284_vm1, %v275_v33, %v271_v35 }
 0x15f   : > { %v262_v32 = vpop.permute.xlu1 %261 }
 0x160   : > { %v279_v34 = vrot.slane %v262_v32, %v270_v31 }
 0x162   : > { %v287_v39 = vsel %vm286_vm2, %v279_v34, %v285_v37 }
 0x163   : > { %v265_v36 = vpop.permute.xlu1 %264 }
 0x164   : > { %v283_v38 = vrot.slane %v265_v36, %v270_v31 }
 0x166   : > { %v289_v40 = vsel %vm288_vm3, %v283_v38, %v287_v39 }
 0x167   : > { %v292_v41 = vsel %vm291_vm4, %v289_v40, 0.0  ;;  %v302_v42 = vpop.permute.xlu1 %301 }
 0x168   : > { %293 = vadd.xlane.f32.xlu0 %v292_v41 }
 0x1f1   : > { %v294_v43 = vpop.xlane.xlu0 %293 }
 0x1f2   : > { %v304_v44 = vadd.f32 %v302_v42, %v294_v43 }
 0x1f4   : > { %v305_v45 = vadd.f32 3.0, %v304_v44 }
 0x1f6   : > { %v306_v46 = vmax.f32 %v305_v45, 0.0 }
 0x1f8   : > { %v307_v47 = vmin.f32 %v306_v46, 6.0 }
 0x1fa   : > { %v308_v48 = vmul.f32 0.16666667, %v307_v47 }
 0x1fc   : > { %311 = vperm.xlu1 %496, %v308_v48  }
 0x277   : > { %v312_v53 = vpop.permute.xlu1 %311 }
 0x278   : > { %v319_v54 = vrot.slane %v312_v53, %v318_v52 }
 0x27a   : > { %v321_v55 = vmul.f32 %v319_v54, %v785_v4 }
 0x27c   : > { %322 = vst [vmem:[%s199_s21] sm:$0xff] %v321_v55 }
 0x27d   : > { %566 = shalt.err (!%p563_p3)
}
 0x27e   : > { %s567_s8 = scalar_lea.hbm %s336_s28, 128  ;;  %s571_s17 = scalar_lea.hbm %s838_s3, 256 }
 0x27f   : > { %p568_p12 = scmp.ne.s32.totalorder %s336_s28, %s567_s8  ;;  %p572_p4 = scmp.lt.s32.totalorder %s336_s28, %s838_s3 }
 0x280   : > { %p573_p6 = scmp.lt.s32.totalorder %s571_s17, %s567_s8 }
 0x281   : > { %p569_p5 = pnand %p568_p12, %p855_p11 }
 0x282   : > { %p574_p8 = por %p573_p6, %p572_p4 }
 0x283   : > { %p570_p7 = pneg %p569_p5 }
 0x285   : > { %p575_p9 = pnand %p574_p8, %p570_p7 }
 0x287   : > { %578 = shalt.err (!%p575_p9)
}
 0x288   : > { %443 = dma.vmem_to_hbm [thread:$0]  (%p855_p11), %s339_s22, 128, %s336_s28, %s324_s29  }
 0x289 PF: > { %s350_s18 = sand.u32 1, %s609_s12   ;;  %p856_p13 = scmp.ne.s32.totalorder %s844_s19, 0 }
 0x28a   : > { %p857_p10 = scmp.ge.s32.totalorder %s621_s15, 2  ;;  %s351_s20 = scalar_lea.sflag [#allocation4], %s350_s18 }
 0x28c   : > { %p454_p1 = pnand %p857_p10, %p856_p13 }
 0x28e   : > { %p455_p2 = pneg %p454_p1 }
 0x290   : > { %604 = dma.done.wait (%p455_p2), %s351_s20, 128  }
 0x291   : > { %606 = vsyncadd (%p455_p2), %s351_s20, 4294967168  ;;  %p17_p0 = scmp.ge.s32.totalorder %s696_s23, 4   ;;  %s858_s12 = smov %s613_s13 }
 0x292   : > { %s859_s13 = smov %s617_s14  ;;  %s860_s14 = smov %s723_s4 }
 0x293   : > { %s861_s15 = smov %s696_s23  ;;  %19 = sbr.rel (!%p17_p0) target bundleno = 6 (0x6), region = 81 }
 0x298   :  { %356 = vsyncpa [#allocation3], 1 }
 0x299   :  { %358 = vsyncpa [#allocation3 + $0x1], 1 }
 0x29a   :  { %359 = vsyncpa [#allocation6], 1 }
 0x29b   :  { %360 = vsyncpa [#allocation4], 1 }
 0x29c   :  { %362 = vsyncpa [#allocation4 + $0x1], 1 }

</bundles_post_ra>
